<compile_context>
chip_gen: v6e
topology: v6e:2x2x1
jax: 0.10.0
libtpu: 0.0.40
codegen_flags: <defaults>
</compile_context>

<pallas_src>
import functools
import math

import jax
import jax.numpy as jnp
from jax.experimental import pallas as pl
from jax.experimental.pallas import tpu as pltpu

LANES = 128
VMEM_LIMIT_BYTES = 64 * 1024 * 1024   # <= physical VMEM on v5e/v6e/v7x


def _round_up(x, m):
    return ((x + m - 1) // m) * m


def _row_tile(m, cap):
    """Full-array block when it fits (always a legal block shape); otherwise a
    sublane-aligned row tile (cap must be a multiple of 16 for bf16 operands)."""
    assert cap % 16 == 0
    return m if m <= cap else cap


# ----------------------------------------------------------------------------
# Kernel 1: row-tiled matmul + bias + ReLU  (conv layers as im2col matmuls)
# ----------------------------------------------------------------------------
def _matmul_bias_relu_kernel(x_ref, w_ref, b_ref, o_ref):
    y = jnp.dot(x_ref[...], w_ref[...], preferred_element_type=jnp.float32)
    y = jnp.maximum(y + b_ref[...], 0.0)
    o_ref[...] = y.astype(o_ref.dtype)


def conv_matmul(x, w, b, *, row_tile=512, out_dtype=jnp.bfloat16):
    """y = relu(x @ w + b), tiled over rows with double-buffered pipelining."""
    M, K = x.shape
    N = w.shape[1]
    tm = _row_tile(M, row_tile)
    return pl.pallas_call(
        _matmul_bias_relu_kernel,
        out_shape=jax.ShapeDtypeStruct((M, N), out_dtype),
        grid=(pl.cdiv(M, tm),),
        in_specs=[
            pl.BlockSpec((tm, K), lambda i: (i, 0)),   # im2col row tile (streamed)
            pl.BlockSpec((K, N), lambda i: (0, 0)),    # weights resident
            pl.BlockSpec((1, N), lambda i: (0, 0)),    # bias resident
        ],
        out_specs=pl.BlockSpec((tm, N), lambda i: (i, 0)),
        compiler_params=pltpu.CompilerParams(
            dimension_semantics=("parallel",),          # shard row tiles over TCs (v7x)
            vmem_limit_bytes=VMEM_LIMIT_BYTES,
        ),
    )(x, w, b)


# ----------------------------------------------------------------------------
# Kernel 2: fused head — fc + LayerNorm + [feat|action] @ (stacked Q1/Q2 MLP)
# ----------------------------------------------------------------------------
def _head_kernel(flat_ref, act_ref, fcw_ref, fcb_ref, g_ref, beta_ref,
                 w1f_ref, w1a_ref, b1_ref, w2_ref, b2_ref, w3_ref, b3_ref,
                 o_ref):
    # fc + LayerNorm (eps=1e-5); stats in f32, one pass, lane-axis reduction only.
    h = jnp.dot(flat_ref[...], fcw_ref[...], preferred_element_type=jnp.float32)
    h = h + fcb_ref[...]
    mean = jnp.mean(h, axis=-1, keepdims=True)
    msq = jnp.mean(h * h, axis=-1, keepdims=True)
    var = jnp.maximum(msq - mean * mean, 0.0)
    feat = (h - mean) * jax.lax.rsqrt(var + 1e-5)
    feat = feat * g_ref[...] + beta_ref[...]

    # Both Q heads with weights stacked along a 128-padded output dim.
    # concat([feat, action]) @ W1  ==  feat @ W1f + action @ W1a  (no concat relayout).
    fcast = feat.astype(w1f_ref.dtype)
    acast = act_ref[...].astype(w1a_ref.dtype)
    t = (jnp.dot(fcast, w1f_ref[...], preferred_element_type=jnp.float32)
         + jnp.dot(acast, w1a_ref[...], preferred_element_type=jnp.float32)
         + b1_ref[...])
    t = jnp.maximum(t, 0.0)
    t = jnp.dot(t.astype(w2_ref.dtype), w2_ref[...],
                preferred_element_type=jnp.float32) + b2_ref[...]
    t = jnp.maximum(t, 0.0)
    q = jnp.dot(t.astype(w3_ref.dtype), w3_ref[...],
                preferred_element_type=jnp.float32) + b3_ref[...]
    o_ref[...] = q.astype(o_ref.dtype)   # lane-dense (M, 128) slab: [q1 | q2 | pad]


def fused_head(flat, action, p, *, row_tile=512):
    M, Kf = flat.shape
    A = action.shape[1]
    QP = p["q_w3"].shape[1]
    tm = _row_tile(M, row_tile)
    args = (flat, action, p["fc_w"], p["fc_b"], p["ln_g"], p["ln_b"],
            p["q_w1f"], p["q_w1a"], p["q_b1"], p["q_w2"], p["q_b2"],
            p["q_w3"], p["q_b3"])
    in_specs = [
        pl.BlockSpec((tm, Kf), lambda i: (i, 0)),       # flat features (row-tiled)
        pl.BlockSpec((tm, A), lambda i: (i, 0)),        # action (row-tiled)
    ] + [pl.BlockSpec(a.shape, lambda i: (0, 0)) for a in args[2:]]
    return pl.pallas_call(
        _head_kernel,
        out_shape=jax.ShapeDtypeStruct((M, QP), jnp.float32),
        grid=(pl.cdiv(M, tm),),
        in_specs=in_specs,
        out_specs=pl.BlockSpec((tm, QP), lambda i: (i, 0)),
        compiler_params=pltpu.CompilerParams(
            dimension_semantics=("parallel",),
            vmem_limit_bytes=VMEM_LIMIT_BYTES,
        ),
    )(*args)


# ----------------------------------------------------------------------------
# Parameter init (deterministic, mirrors weight_init in the PyTorch module)
# ----------------------------------------------------------------------------
def orthogonal(key, rows, cols, gain=1.0):
    a = jax.random.normal(key, (rows, cols), dtype=jnp.float32)
    if rows < cols:
        q, r = jnp.linalg.qr(a.T)
        q = (q * jnp.sign(jnp.diag(r))).T
    else:
        q, r = jnp.linalg.qr(a)
        q = q * jnp.sign(jnp.diag(r))
    return gain * q[:rows, :cols]


def conv_center_weight(key, cout, cin, k=3):
    """Torch conv weight (zeros except center tap = orthogonal * relu gain),
    laid out for NHWC im2col: rows ordered (ki, kj, cin), cols = cout."""
    core = orthogonal(key, cout, cin, gain=math.sqrt(2.0))      # (cout, cin)
    w = jnp.zeros((k, k, cin, cout), jnp.float32)
    w = w.at[k // 2, k // 2].set(core.T)
    return w.reshape(k * k * cin, cout)


def init_qr_critic(key, obs_shape, action_dim, hidden_dim, n_quantiles,
                   feature_dim, num_layers, num_filters):
    assert num_layers == 2   # demo encoder: conv(s=2) -> relu -> conv(s=1) -> relu
    C, H, W = obs_shape
    keys = jax.random.split(key, 8)
    h1 = (H - 3) // 2 + 1
    w1 = (W - 3) // 2 + 1
    h2, w2 = h1 - 2, w1 - 2
    flat_dim = num_filters * h2 * w2

    p = {}
    # obs/255 folded into conv1 weights (drops one full HBM pass in the wrapper).
    p["conv1_w"] = (conv_center_weight(keys[0], num_filters, C) / 255.0).astype(jnp.bfloat16)
    p["conv1_b"] = jnp.zeros((1, num_filters), jnp.float32)
    p["conv2_w"] = conv_center_weight(keys[1], num_filters, num_filters).astype(jnp.bfloat16)
    p["conv2_b"] = jnp.zeros((1, num_filters), jnp.float32)

    # fc weight with the NCHW-flatten permutation folded into its rows, so the
    # wrapper can flatten the NHWC conv output directly (no transpose pass).
    wt = orthogonal(keys[2], feature_dim, flat_dim)              # torch (out, in=C*H*W)
    wt = wt.reshape(feature_dim, num_filters, h2, w2)
    wt = jnp.transpose(wt, (0, 2, 3, 1))                         # (out, h, w, c)
    p["fc_w"] = wt.reshape(feature_dim, flat_dim).T.astype(jnp.bfloat16)   # (h*w*c, out)
    p["fc_b"] = jnp.zeros((1, feature_dim), jnp.float32)
    p["ln_g"] = jnp.ones((1, feature_dim), jnp.float32)
    p["ln_b"] = jnp.zeros((1, feature_dim), jnp.float32)

    # Two Q heads stacked along a lane-dense (128-padded) output dim; hidden layers
    # are block-diagonal so one matmul per layer evaluates both heads exactly.
    F, A = feature_dim, action_dim
    HS = 2 * hidden_dim
    HP = max(LANES, _round_up(HS, LANES))
    QP = max(LANES, _round_up(2 * n_quantiles, LANES))
    a_pad = _round_up(A, 8)                                       # sublane-align action

    def q_head(k):
        k1, k2, k3 = jax.random.split(k, 3)
        return (orthogonal(k1, hidden_dim, F + A),                # torch (out, in)
                orthogonal(k2, hidden_dim, hidden_dim),
                orthogonal(k3, n_quantiles, hidden_dim))

    q1w1, q1w2, q1w3 = q_head(keys[3])
    q2w1, q2w2, q2w3 = q_head(keys[4])

    w1f = jnp.zeros((F, HP), jnp.float32)
    w1f = w1f.at[:, :hidden_dim].set(q1w1[:, :F].T)
    w1f = w1f.at[:, hidden_dim:HS].set(q2w1[:, :F].T)
    w1a = jnp.zeros((a_pad, HP), jnp.float32)
    w1a = w1a.at[:A, :hidden_dim].set(q1w1[:, F:].T)
    w1a = w1a.at[:A, hidden_dim:HS].set(q2w1[:, F:].T)
    w2m = jnp.zeros((HP, HP), jnp.float32)
    w2m = w2m.at[:hidden_dim, :hidden_dim].set(q1w2.T)
    w2m = w2m.at[hidden_dim:HS, hidden_dim:HS].set(q2w2.T)
    w3m = jnp.zeros((HP, QP), jnp.float32)
    w3m = w3m.at[:hidden_dim, :n_quantiles].set(q1w3.T)
    w3m = w3m.at[hidden_dim:HS, n_quantiles:2 * n_quantiles].set(q2w3.T)

    p["q_w1f"] = w1f.astype(jnp.bfloat16)
    p["q_w1a"] = w1a.astype(jnp.bfloat16)
    p["q_b1"] = jnp.zeros((1, HP), jnp.float32)
    p["q_w2"] = w2m.astype(jnp.bfloat16)
    p["q_b2"] = jnp.zeros((1, HP), jnp.float32)
    p["q_w3"] = w3m.astype(jnp.bfloat16)
    p["q_b3"] = jnp.zeros((1, QP), jnp.float32)
    return p


# ----------------------------------------------------------------------------
# Forward pass
# ----------------------------------------------------------------------------
def im2col_nhwc(x, kh, kw, stride):
    """Index-only gather: (N,H,W,C) -> (N*Hout*Wout, kh*kw*C); fuses with the
    surrounding transpose/reshape under jit.
    TODO(synk): move the 9-tap gather inside the conv kernel (pl.ds over shifted
    windows) to avoid materializing the ~9x patch matrix in HBM at CURL scale."""
    N, H, W, C = x.shape
    hout = (H - kh) // stride + 1
    wout = (W - kw) // stride + 1
    taps = [x[:, i:i + stride * hout:stride, j:j + stride * wout:stride, :]
            for i in range(kh) for j in range(kw)]
    p = jnp.stack(taps, axis=3)                         # (N, Hout, Wout, kh*kw, C)
    return p.reshape(N * hout * wout, kh * kw * C), hout, wout


def qr_critic_forward(params, obs_nchw, action, *, n_quantiles, row_tile=512):
    """Returns (quantiles1, quantiles2), matching QRCritic.forward semantics."""
    N = obs_nchw.shape[0]
    # NCHW -> NHWC in bf16; the /255 scale is folded into conv1 weights.
    x = jnp.transpose(obs_nchw, (0, 2, 3, 1)).astype(jnp.bfloat16)

    p1, h1, w1 = im2col_nhwc(x, 3, 3, 2)
    c1 = conv_matmul(p1, params["conv1_w"], params["conv1_b"], row_tile=row_tile)
    x1 = c1.reshape(N, h1, w1, -1)

    p2, _, _ = im2col_nhwc(x1, 3, 3, 1)
    c2 = conv_matmul(p2, params["conv2_w"], params["conv2_b"], row_tile=row_tile)

    # NHWC flatten; the NCHW-flatten permutation is folded into fc_w rows.
    flat = c2.reshape(N, -1)

    if action.ndim == 1:
        action = action[:, None]
    a_pad = params["q_w1a"].shape[0]
    act = jnp.pad(action.astype(jnp.float32),
                  ((0, 0), (0, a_pad - action.shape[1])))

    # TODO(synk): detach_encoder is a gradient-flow flag; no effect on forward values.
    out = fused_head(flat, act, params, row_tile=row_tile)
    q1 = out[:, :n_quantiles]
    q2 = out[:, n_quantiles:2 * n_quantiles]
    return q1, q2


# ----------------------------------------------------------------------------
if __name__ == "__main__":
    key = jax.random.PRNGKey(0)
    k_param, k_obs, k_act = jax.random.split(key, 3)

    # small, module-consistent shapes
    obs_shape = (4, 16, 16)       # (C, H, W) stacked frames
    action_dim = 2
    hidden_dim = 32
    n_quantiles = 8
    feature_dim = 32
    num_layers = 2
    num_filters = 8
    batch = 2

    params = init_qr_critic(k_param, obs_shape, action_dim, hidden_dim,
                            n_quantiles, feature_dim, num_layers, num_filters)

    obs = jax.random.uniform(k_obs, (batch,) + obs_shape,
                             minval=0.0, maxval=255.0, dtype=jnp.float32)
    action = jax.random.normal(k_act, (batch, action_dim), dtype=jnp.float32)

    fwd = jax.jit(functools.partial(qr_critic_forward,
                                    n_quantiles=n_quantiles, row_tile=512))
    q1, q2 = fwd(params, obs, action)
    jax.block_until_ready((q1, q2))
    assert q1.shape == (batch, n_quantiles) and q2.shape == (batch, n_quantiles)

    # Exercise the multi-block / partial-last-block tiling path on the same small
    # shapes and check it matches the single-block result.
    fwd_tiled = jax.jit(functools.partial(qr_critic_forward,
                                          n_quantiles=n_quantiles, row_tile=32))
    q1t, q2t = fwd_tiled(params, obs, action)
    jax.block_until_ready((q1t, q2t))
    assert jnp.allclose(q1, q1t, atol=1e-3, rtol=1e-3)
    assert jnp.allclose(q2, q2t, atol=1e-3, rtol=1e-3)

    print("KERNEL_OK")
</pallas_src>

<mosaic_0001>
module attributes {stable_mosaic.version = 11 : i64} {
  func.func @_matmul_bias_relu_kernel(%arg0: i32, %arg1: memref<98x36xbf16, #tpu.memory_space<vmem>>, %arg2: memref<36x8xbf16, #tpu.memory_space<vmem>>, %arg3: memref<1x8xf32, #tpu.memory_space<vmem>>, %arg4: memref<98x8xbf16, #tpu.memory_space<vmem>>) attributes {dimension_semantics = [#tpu.dimension_semantics<parallel>], iteration_bounds = array<i64: 1>, scalar_prefetch = 0 : i64, scratch_operands = 0 : i64, tpu.core_type = #tpu.core_type<tc>, window_params = [{transform_indices = @transform_0, window_bounds = array<i64: 98, 36>}, {pipeline_mode = #tpu.pipeline_mode<synchronous>, transform_indices = @transform_1, window_bounds = array<i64: 36, 8>}, {pipeline_mode = #tpu.pipeline_mode<synchronous>, transform_indices = @transform_2, window_bounds = array<i64: 1, 8>}, {transform_indices = @transform_3, window_bounds = array<i64: 98, 8>}]} {
    %c0 = arith.constant 0 : index
    %c0_0 = arith.constant 0 : index
    %0 = vector.load %arg1[%c0, %c0_0] : memref<98x36xbf16, #tpu.memory_space<vmem>>, vector<98x36xbf16>
    %c0_1 = arith.constant 0 : index
    %c0_2 = arith.constant 0 : index
    %1 = vector.load %arg2[%c0_1, %c0_2] : memref<36x8xbf16, #tpu.memory_space<vmem>>, vector<36x8xbf16>
    %cst = arith.constant dense<0.000000e+00> : vector<98x8xf32>
    %2 = tpu.matmul %0, %1, %cst {dimension_numbers = #tpu.dot_dimension_numbers<[1], [0], [0], [1], [0, 0, 1, 1], [], []>} : vector<98x36xbf16>, vector<36x8xbf16>, vector<98x8xf32> -> vector<98x8xf32>
    %c0_3 = arith.constant 0 : index
    %c0_4 = arith.constant 0 : index
    %3 = vector.load %arg3[%c0_3, %c0_4] : memref<1x8xf32, #tpu.memory_space<vmem>>, vector<1x8xf32>
    %4 = vector.broadcast %3 : vector<1x8xf32> to vector<98x8xf32>
    %5 = arith.addf %2, %4 : vector<98x8xf32>
    %cst_5 = arith.constant 0.000000e+00 : f32
    %6 = vector.broadcast %cst_5 : f32 to vector<98x8xf32>
    %7 = arith.maximumf %5, %6 : vector<98x8xf32>
    %8 = arith.truncf %7 : vector<98x8xf32> to vector<98x8xbf16>
    %c0_6 = arith.constant 0 : index
    %c0_7 = arith.constant 0 : index
    %9 = vector.load %arg4[%c0_6, %c0_7] : memref<98x8xbf16, #tpu.memory_space<vmem>>, vector<98x8xbf16>
    tpu.vector_store %arg4[%c0_6, %c0_7], %8 {strides = array<i32>} : memref<98x8xbf16, #tpu.memory_space<vmem>>, vector<98x8xbf16>,
    return
  }
  func.func @transform_0(%arg0: i32) -> (i32, i32) {
    %c0_i32 = arith.constant 0 : i32
    %c0_i32_0 = arith.constant 0 : i32
    return %arg0, %c0_i32 : i32, i32
  }
  func.func @transform_1(%arg0: i32) -> (i32, i32) {
    %c0_i32 = arith.constant 0 : i32
    %c0_i32_0 = arith.constant 0 : i32
    %c0_i32_1 = arith.constant 0 : i32
    return %c0_i32, %c0_i32_0 : i32, i32
  }
  func.func @transform_2(%arg0: i32) -> (i32, i32) {
    %c0_i32 = arith.constant 0 : i32
    %c0_i32_0 = arith.constant 0 : i32
    %c0_i32_1 = arith.constant 0 : i32
    return %c0_i32, %c0_i32_0 : i32, i32
  }
  func.func @transform_3(%arg0: i32) -> (i32, i32) {
    %c0_i32 = arith.constant 0 : i32
    %c0_i32_0 = arith.constant 0 : i32
    return %arg0, %c0_i32 : i32, i32
  }
}

module attributes {stable_mosaic.version = 11 : i64} {
  func.func @_matmul_bias_relu_kernel(%arg0: i32, %arg1: memref<50x72xbf16, #tpu.memory_space<vmem>>, %arg2: memref<72x8xbf16, #tpu.memory_space<vmem>>, %arg3: memref<1x8xf32, #tpu.memory_space<vmem>>, %arg4: memref<50x8xbf16, #tpu.memory_space<vmem>>) attributes {dimension_semantics = [#tpu.dimension_semantics<parallel>], iteration_bounds = array<i64: 1>, scalar_prefetch = 0 : i64, scratch_operands = 0 : i64, tpu.core_type = #tpu.core_type<tc>, window_params = [{transform_indices = @transform_0, window_bounds = array<i64: 50, 72>}, {pipeline_mode = #tpu.pipeline_mode<synchronous>, transform_indices = @transform_1, window_bounds = array<i64: 72, 8>}, {pipeline_mode = #tpu.pipeline_mode<synchronous>, transform_indices = @transform_2, window_bounds = array<i64: 1, 8>}, {transform_indices = @transform_3, window_bounds = array<i64: 50, 8>}]} {
    %c0 = arith.constant 0 : index
    %c0_0 = arith.constant 0 : index
    %0 = vector.load %arg1[%c0, %c0_0] : memref<50x72xbf16, #tpu.memory_space<vmem>>, vector<50x72xbf16>
    %c0_1 = arith.constant 0 : index
    %c0_2 = arith.constant 0 : index
    %1 = vector.load %arg2[%c0_1, %c0_2] : memref<72x8xbf16, #tpu.memory_space<vmem>>, vector<72x8xbf16>
    %cst = arith.constant dense<0.000000e+00> : vector<50x8xf32>
    %2 = tpu.matmul %0, %1, %cst {dimension_numbers = #tpu.dot_dimension_numbers<[1], [0], [0], [1], [0, 0, 1, 1], [], []>} : vector<50x72xbf16>, vector<72x8xbf16>, vector<50x8xf32> -> vector<50x8xf32>
    %c0_3 = arith.constant 0 : index
    %c0_4 = arith.constant 0 : index
    %3 = vector.load %arg3[%c0_3, %c0_4] : memref<1x8xf32, #tpu.memory_space<vmem>>, vector<1x8xf32>
    %4 = vector.broadcast %3 : vector<1x8xf32> to vector<50x8xf32>
    %5 = arith.addf %2, %4 : vector<50x8xf32>
    %cst_5 = arith.constant 0.000000e+00 : f32
    %6 = vector.broadcast %cst_5 : f32 to vector<50x8xf32>
    %7 = arith.maximumf %5, %6 : vector<50x8xf32>
    %8 = arith.truncf %7 : vector<50x8xf32> to vector<50x8xbf16>
    %c0_6 = arith.constant 0 : index
    %c0_7 = arith.constant 0 : index
    %9 = vector.load %arg4[%c0_6, %c0_7] : memref<50x8xbf16, #tpu.memory_space<vmem>>, vector<50x8xbf16>
    tpu.vector_store %arg4[%c0_6, %c0_7], %8 {strides = array<i32>} : memref<50x8xbf16, #tpu.memory_space<vmem>>, vector<50x8xbf16>,
    return
  }
  func.func @transform_0(%arg0: i32) -> (i32, i32) {
    %c0_i32 = arith.constant 0 : i32
    %c0_i32_0 = arith.constant 0 : i32
    return %arg0, %c0_i32 : i32, i32
  }
  func.func @transform_1(%arg0: i32) -> (i32, i32) {
    %c0_i32 = arith.constant 0 : i32
    %c0_i32_0 = arith.constant 0 : i32
    %c0_i32_1 = arith.constant 0 : i32
    return %c0_i32, %c0_i32_0 : i32, i32
  }
  func.func @transform_2(%arg0: i32) -> (i32, i32) {
    %c0_i32 = arith.constant 0 : i32
    %c0_i32_0 = arith.constant 0 : i32
    %c0_i32_1 = arith.constant 0 : i32
    return %c0_i32, %c0_i32_0 : i32, i32
  }
  func.func @transform_3(%arg0: i32) -> (i32, i32) {
    %c0_i32 = arith.constant 0 : i32
    %c0_i32_0 = arith.constant 0 : i32
    return %arg0, %c0_i32 : i32, i32
  }
}

module attributes {stable_mosaic.version = 11 : i64} {
  func.func @_head_kernel(%arg0: i32, %arg1: memref<2x200xbf16, #tpu.memory_space<vmem>>, %arg2: memref<2x8xf32, #tpu.memory_space<vmem>>, %arg3: memref<200x32xbf16, #tpu.memory_space<vmem>>, %arg4: memref<1x32xf32, #tpu.memory_space<vmem>>, %arg5: memref<1x32xf32, #tpu.memory_space<vmem>>, %arg6: memref<1x32xf32, #tpu.memory_space<vmem>>, %arg7: memref<32x128xbf16, #tpu.memory_space<vmem>>, %arg8: memref<8x128xbf16, #tpu.memory_space<vmem>>, %arg9: memref<1x128xf32, #tpu.memory_space<vmem>>, %arg10: memref<128x128xbf16, #tpu.memory_space<vmem>>, %arg11: memref<1x128xf32, #tpu.memory_space<vmem>>, %arg12: memref<128x128xbf16, #tpu.memory_space<vmem>>, %arg13: memref<1x128xf32, #tpu.memory_space<vmem>>, %arg14: memref<2x128xf32, #tpu.memory_space<vmem>>) attributes {dimension_semantics = [#tpu.dimension_semantics<parallel>], iteration_bounds = array<i64: 1>, scalar_prefetch = 0 : i64, scratch_operands = 0 : i64, tpu.core_type = #tpu.core_type<tc>, window_params = [{transform_indices = @transform_0, window_bounds = array<i64: 2, 200>}, {transform_indices = @transform_1, window_bounds = array<i64: 2, 8>}, {pipeline_mode = #tpu.pipeline_mode<synchronous>, transform_indices = @transform_2, window_bounds = array<i64: 200, 32>}, {pipeline_mode = #tpu.pipeline_mode<synchronous>, transform_indices = @transform_3, window_bounds = array<i64: 1, 32>}, {pipeline_mode = #tpu.pipeline_mode<synchronous>, transform_indices = @transform_4, window_bounds = array<i64: 1, 32>}, {pipeline_mode = #tpu.pipeline_mode<synchronous>, transform_indices = @transform_5, window_bounds = array<i64: 1, 32>}, {pipeline_mode = #tpu.pipeline_mode<synchronous>, transform_indices = @transform_6, window_bounds = array<i64: 32, 128>}, {pipeline_mode = #tpu.pipeline_mode<synchronous>, transform_indices = @transform_7, window_bounds = array<i64: 8, 128>}, {pipeline_mode = #tpu.pipeline_mode<synchronous>, transform_indices = @transform_8, window_bounds = array<i64: 1, 128>}, {pipeline_mode = #tpu.pipeline_mode<synchronous>, transform_indices = @transform_9, window_bounds = array<i64: 128, 128>}, {pipeline_mode = #tpu.pipeline_mode<synchronous>, transform_indices = @transform_10, window_bounds = array<i64: 1, 128>}, {pipeline_mode = #tpu.pipeline_mode<synchronous>, transform_indices = @transform_11, window_bounds = array<i64: 128, 128>}, {pipeline_mode = #tpu.pipeline_mode<synchronous>, transform_indices = @transform_12, window_bounds = array<i64: 1, 128>}, {transform_indices = @transform_13, window_bounds = array<i64: 2, 128>}]} {
    %c0 = arith.constant 0 : index
    %c0_0 = arith.constant 0 : index
    %0 = vector.load %arg1[%c0, %c0_0] : memref<2x200xbf16, #tpu.memory_space<vmem>>, vector<2x200xbf16>
    %c0_1 = arith.constant 0 : index
    %c0_2 = arith.constant 0 : index
    %1 = vector.load %arg3[%c0_1, %c0_2] : memref<200x32xbf16, #tpu.memory_space<vmem>>, vector<200x32xbf16>
    %cst = arith.constant dense<0.000000e+00> : vector<2x32xf32>
    %2 = tpu.matmul %0, %1, %cst {dimension_numbers = #tpu.dot_dimension_numbers<[1], [0], [0], [1], [0, 0, 1, 1], [], []>} : vector<2x200xbf16>, vector<200x32xbf16>, vector<2x32xf32> -> vector<2x32xf32>
    %c0_3 = arith.constant 0 : index
    %c0_4 = arith.constant 0 : index
    %3 = vector.load %arg4[%c0_3, %c0_4] : memref<1x32xf32, #tpu.memory_space<vmem>>, vector<1x32xf32>
    %4 = vector.broadcast %3 : vector<1x32xf32> to vector<2x32xf32>
    %5 = arith.addf %2, %4 : vector<2x32xf32>
    %cst_5 = arith.constant dense<0.000000e+00> : vector<2xf32>
    %6 = vector.multi_reduction <add>, %5, %cst_5 [1] : vector<2x32xf32> to vector<2xf32>
    %7 = vector.shape_cast %6 : vector<2xf32> to vector<2x1xf32>
    %cst_6 = arith.constant 3.200000e+01 : f32
    %8 = vector.broadcast %cst_6 : f32 to vector<2x1xf32>
    %9 = arith.divf %7, %8 : vector<2x1xf32>
    %10 = arith.mulf %5, %5 : vector<2x32xf32>
    %cst_7 = arith.constant dense<0.000000e+00> : vector<2xf32>
    %11 = vector.multi_reduction <add>, %10, %cst_7 [1] : vector<2x32xf32> to vector<2xf32>
    %12 = vector.shape_cast %11 : vector<2xf32> to vector<2x1xf32>
    %cst_8 = arith.constant 3.200000e+01 : f32
    %13 = vector.broadcast %cst_8 : f32 to vector<2x1xf32>
    %14 = arith.divf %12, %13 : vector<2x1xf32>
    %15 = arith.mulf %9, %9 : vector<2x1xf32>
    %16 = arith.subf %14, %15 : vector<2x1xf32>
    %cst_9 = arith.constant 0.000000e+00 : f32
    %17 = vector.broadcast %cst_9 : f32 to vector<2x1xf32>
    %18 = arith.maximumf %16, %17 : vector<2x1xf32>
    %19 = vector.broadcast %9 : vector<2x1xf32> to vector<2x32xf32>
    %20 = arith.subf %5, %19 : vector<2x32xf32>
    %cst_10 = arith.constant 9.99999974E-6 : f32
    %21 = vector.broadcast %cst_10 : f32 to vector<2x1xf32>
    %22 = arith.addf %18, %21 : vector<2x1xf32>
    %23 = math.rsqrt %22 : vector<2x1xf32>
    %24 = vector.broadcast %23 : vector<2x1xf32> to vector<2x32xf32>
    %25 = arith.mulf %20, %24 : vector<2x32xf32>
    %c0_11 = arith.constant 0 : index
    %c0_12 = arith.constant 0 : index
    %26 = vector.load %arg5[%c0_11, %c0_12] : memref<1x32xf32, #tpu.memory_space<vmem>>, vector<1x32xf32>
    %27 = vector.broadcast %26 : vector<1x32xf32> to vector<2x32xf32>
    %28 = arith.mulf %25, %27 : vector<2x32xf32>
    %c0_13 = arith.constant 0 : index
    %c0_14 = arith.constant 0 : index
    %29 = vector.load %arg6[%c0_13, %c0_14] : memref<1x32xf32, #tpu.memory_space<vmem>>, vector<1x32xf32>
    %30 = vector.broadcast %29 : vector<1x32xf32> to vector<2x32xf32>
    %31 = arith.addf %28, %30 : vector<2x32xf32>
    %32 = arith.truncf %31 : vector<2x32xf32> to vector<2x32xbf16>
    %c0_15 = arith.constant 0 : index
    %c0_16 = arith.constant 0 : index
    %33 = vector.load %arg2[%c0_15, %c0_16] : memref<2x8xf32, #tpu.memory_space<vmem>>, vector<2x8xf32>
    %34 = arith.truncf %33 : vector<2x8xf32> to vector<2x8xbf16>
    %c0_17 = arith.constant 0 : index
    %c0_18 = arith.constant 0 : index
    %35 = vector.load %arg7[%c0_17, %c0_18] : memref<32x128xbf16, #tpu.memory_space<vmem>>, vector<32x128xbf16>
    %cst_19 = arith.constant dense<0.000000e+00> : vector<2x128xf32>
    %36 = tpu.matmul %32, %35, %cst_19 {dimension_numbers = #tpu.dot_dimension_numbers<[1], [0], [0], [1], [0, 0, 1, 1], [], []>} : vector<2x32xbf16>, vector<32x128xbf16>, vector<2x128xf32> -> vector<2x128xf32>
    %c0_20 = arith.constant 0 : index
    %c0_21 = arith.constant 0 : index
    %37 = vector.load %arg8[%c0_20, %c0_21] : memref<8x128xbf16, #tpu.memory_space<vmem>>, vector<8x128xbf16>
    %cst_22 = arith.constant dense<0.000000e+00> : vector<2x128xf32>
    %38 = tpu.matmul %34, %37, %cst_22 {dimension_numbers = #tpu.dot_dimension_numbers<[1], [0], [0], [1], [0, 0, 1, 1], [], []>} : vector<2x8xbf16>, vector<8x128xbf16>, vector<2x128xf32> -> vector<2x128xf32>
    %39 = arith.addf %36, %38 : vector<2x128xf32>
    %c0_23 = arith.constant 0 : index
    %c0_24 = arith.constant 0 : index
    %40 = vector.load %arg9[%c0_23, %c0_24] : memref<1x128xf32, #tpu.memory_space<vmem>>, vector<1x128xf32>
    %41 = vector.broadcast %40 : vector<1x128xf32> to vector<2x128xf32>
    %42 = arith.addf %39, %41 : vector<2x128xf32>
    %cst_25 = arith.constant 0.000000e+00 : f32
    %43 = vector.broadcast %cst_25 : f32 to vector<2x128xf32>
    %44 = arith.maximumf %42, %43 : vector<2x128xf32>
    %45 = arith.truncf %44 : vector<2x128xf32> to vector<2x128xbf16>
    %c0_26 = arith.constant 0 : index
    %c0_27 = arith.constant 0 : index
    %46 = vector.load %arg10[%c0_26, %c0_27] : memref<128x128xbf16, #tpu.memory_space<vmem>>, vector<128x128xbf16>
    %cst_28 = arith.constant dense<0.000000e+00> : vector<2x128xf32>
    %47 = tpu.matmul %45, %46, %cst_28 {dimension_numbers = #tpu.dot_dimension_numbers<[1], [0], [0], [1], [0, 0, 1, 1], [], []>} : vector<2x128xbf16>, vector<128x128xbf16>, vector<2x128xf32> -> vector<2x128xf32>
    %c0_29 = arith.constant 0 : index
    %c0_30 = arith.constant 0 : index
    %48 = vector.load %arg11[%c0_29, %c0_30] : memref<1x128xf32, #tpu.memory_space<vmem>>, vector<1x128xf32>
    %49 = vector.broadcast %48 : vector<1x128xf32> to vector<2x128xf32>
    %50 = arith.addf %47, %49 : vector<2x128xf32>
    %cst_31 = arith.constant 0.000000e+00 : f32
    %51 = vector.broadcast %cst_31 : f32 to vector<2x128xf32>
    %52 = arith.maximumf %50, %51 : vector<2x128xf32>
    %53 = arith.truncf %52 : vector<2x128xf32> to vector<2x128xbf16>
    %c0_32 = arith.constant 0 : index
    %c0_33 = arith.constant 0 : index
    %54 = vector.load %arg12[%c0_32, %c0_33] : memref<128x128xbf16, #tpu.memory_space<vmem>>, vector<128x128xbf16>
    %cst_34 = arith.constant dense<0.000000e+00> : vector<2x128xf32>
    %55 = tpu.matmul %53, %54, %cst_34 {dimension_numbers = #tpu.dot_dimension_numbers<[1], [0], [0], [1], [0, 0, 1, 1], [], []>} : vector<2x128xbf16>, vector<128x128xbf16>, vector<2x128xf32> -> vector<2x128xf32>
    %c0_35 = arith.constant 0 : index
    %c0_36 = arith.constant 0 : index
    %56 = vector.load %arg13[%c0_35, %c0_36] : memref<1x128xf32, #tpu.memory_space<vmem>>, vector<1x128xf32>
    %57 = vector.broadcast %56 : vector<1x128xf32> to vector<2x128xf32>
    %58 = arith.addf %55, %57 : vector<2x128xf32>
    %c0_37 = arith.constant 0 : index
    %c0_38 = arith.constant 0 : index
    %59 = vector.load %arg14[%c0_37, %c0_38] : memref<2x128xf32, #tpu.memory_space<vmem>>, vector<2x128xf32>
    tpu.vector_store %arg14[%c0_37, %c0_38], %58 {strides = array<i32>} : memref<2x128xf32, #tpu.memory_space<vmem>>, vector<2x128xf32>,
    return
  }
  func.func @transform_0(%arg0: i32) -> (i32, i32) {
    %c0_i32 = arith.constant 0 : i32
    %c0_i32_0 = arith.constant 0 : i32
    return %arg0, %c0_i32 : i32, i32
  }
  func.func @transform_1(%arg0: i32) -> (i32, i32) {
    %c0_i32 = arith.constant 0 : i32
    %c0_i32_0 = arith.constant 0 : i32
    return %arg0, %c0_i32 : i32, i32
  }
  func.func @transform_2(%arg0: i32) -> (i32, i32) {
    %c0_i32 = arith.constant 0 : i32
    %c0_i32_0 = arith.constant 0 : i32
    %c0_i32_1 = arith.constant 0 : i32
    return %c0_i32, %c0_i32_0 : i32, i32
  }
  func.func @transform_3(%arg0: i32) -> (i32, i32) {
    %c0_i32 = arith.constant 0 : i32
    %c0_i32_0 = arith.constant 0 : i32
    %c0_i32_1 = arith.constant 0 : i32
    return %c0_i32, %c0_i32_0 : i32, i32
  }
  func.func @transform_4(%arg0: i32) -> (i32, i32) {
    %c0_i32 = arith.constant 0 : i32
    %c0_i32_0 = arith.constant 0 : i32
    %c0_i32_1 = arith.constant 0 : i32
    return %c0_i32, %c0_i32_0 : i32, i32
  }
  func.func @transform_5(%arg0: i32) -> (i32, i32) {
    %c0_i32 = arith.constant 0 : i32
    %c0_i32_0 = arith.constant 0 : i32
    %c0_i32_1 = arith.constant 0 : i32
    return %c0_i32, %c0_i32_0 : i32, i32
  }
  func.func @transform_6(%arg0: i32) -> (i32, i32) {
    %c0_i32 = arith.constant 0 : i32
    %c0_i32_0 = arith.constant 0 : i32
    %c0_i32_1 = arith.constant 0 : i32
    return %c0_i32, %c0_i32_0 : i32, i32
  }
  func.func @transform_7(%arg0: i32) -> (i32, i32) {
    %c0_i32 = arith.constant 0 : i32
    %c0_i32_0 = arith.constant 0 : i32
    %c0_i32_1 = arith.constant 0 : i32
    return %c0_i32, %c0_i32_0 : i32, i32
  }
  func.func @transform_8(%arg0: i32) -> (i32, i32) {
    %c0_i32 = arith.constant 0 : i32
    %c0_i32_0 = arith.constant 0 : i32
    %c0_i32_1 = arith.constant 0 : i32
    return %c0_i32, %c0_i32_0 : i32, i32
  }
  func.func @transform_9(%arg0: i32) -> (i32, i32) {
    %c0_i32 = arith.constant 0 : i32
    %c0_i32_0 = arith.constant 0 : i32
    %c0_i32_1 = arith.constant 0 : i32
    return %c0_i32, %c0_i32_0 : i32, i32
  }
  func.func @transform_10(%arg0: i32) -> (i32, i32) {
    %c0_i32 = arith.constant 0 : i32
    %c0_i32_0 = arith.constant 0 : i32
    %c0_i32_1 = arith.constant 0 : i32
    return %c0_i32, %c0_i32_0 : i32, i32
  }
  func.func @transform_11(%arg0: i32) -> (i32, i32) {
    %c0_i32 = arith.constant 0 : i32
    %c0_i32_0 = arith.constant 0 : i32
    %c0_i32_1 = arith.constant 0 : i32
    return %c0_i32, %c0_i32_0 : i32, i32
  }
  func.func @transform_12(%arg0: i32) -> (i32, i32) {
    %c0_i32 = arith.constant 0 : i32
    %c0_i32_0 = arith.constant 0 : i32
    %c0_i32_1 = arith.constant 0 : i32
    return %c0_i32, %c0_i32_0 : i32, i32
  }
  func.func @transform_13(%arg0: i32) -> (i32, i32) {
    %c0_i32 = arith.constant 0 : i32
    %c0_i32_0 = arith.constant 0 : i32
    return %arg0, %c0_i32 : i32, i32
  }
}

</mosaic_0001>

<bundles_post_ra>
// kernel: qr_critic_forward.3
= control target key start
LH: loop header
LB: loop body
LE: loop exit
PB: predicated region body
PF: predicated region fallthrough
CT: control target
= control target key end

     0   :  { %vm110_vm0 = vcmask 1041408   ;;  %v393_v0 = vmov 0.0   ;;  %vm394_vm1 = vmmov 0   ;;  %vm88_vm2 = vcmask 293888   ;;  %s528_s1 = inlined_call_operand.vmem [shape: bf16[36,8], index: 1, kind: input, shape index: {}]   ;;  %s529_s0 = inlined_call_operand.vmem [shape: bf16[98,36], index: 0, kind: input, shape index: {}]   ;;  %s530_s2 = inlined_call_operand.vmem [shape: f32[1,8], index: 2, kind: input, shape index: {}]   ;;  %s531_s3 = inlined_call_operand.vmem [shape: bf16[98,8], index: 3, kind: output, shape index: {}]  }
   0x1   :  { %341 = vmatprep.subr.bf16.mxu0 %v393_v0  ;;  %v383_v1 = vld [vmem:[%s528_s1 + $0x10] ss:$0 sps:$4 sm:$0x33]   ;;  %375 = vmatprep.subr.bf16.mxu1 %v393_v0  ;;  %v384_v3 = vld [vmem:[%s528_s1 + $0x8] sm:$0xff]   ;;  %v385_v4 = vld [vmem:[%s528_s1] sm:$0xff]   ;;  %vm268_vm3 = vcmask 60416  }
   0x2   :  { %347 = vmatprep.mubr.msk.bf16.mxu0 %vm394_vm1, %v393_v0  ;;  %363 = vmatprep.mubr.msk.bf16.mxu1 %vm394_vm1, %v393_v0  ;;  %v112_v2 = vsel %vm110_vm0, %v383_v1, 0  ;;  %v386_v5 = vld [vmem:[%s529_s0] sm:$0xff]   ;;  %v388_v7 = vld [vmem:[%s529_s0 + $0x8] sm:$0xff]   ;;  %v390_v9 = vld [vmem:[%s529_s0 + $0x10] sm:$0xff]   ;;  %vm281_vm4 = vcmask 57344  }
   0x3   :  { %342 = vmatpush3.bf16.msra.mxu0 %v112_v2  ;;  %378 = vmatpush3.bf16.msra.mxu1 %v112_v2  ;;  %v387_v6 = vld [vmem:[%s529_s0 + $0x20] sm:$0xff]   ;;  %v389_v8 = vld [vmem:[%s529_s0 + $0x28] sm:$0xff]   ;;  %v391_v10 = vld [vmem:[%s529_s0 + $0x30] ss:$0 sps:$4 sm:$0x11]  }
   0x4   :  { %343 = vmatprep.subr.bf16.mxu0 %v393_v0  ;;  %376 = vmatprep.subr.bf16.mxu1 %v393_v0  ;;  %v392_v11 = vld [vmem:[%s529_s0 + $0x18] sm:$0xff]   ;;  %v462_v12 = vld [vmem:[%s530_s2] ss:$0 sm:$0xff] }
   0x7   :  { %344 = vmatpush3.bf16.msra.mxu0 %v384_v3  ;;  %379 = vmatpush3.bf16.msra.mxu1 %v384_v3 }
   0x8   :  { %345 = vmatprep.subr.bf16.mxu0 %v393_v0  ;;  %377 = vmatprep.subr.bf16.mxu1 %v393_v0 }
   0xb   :  { %346 = vmatpush3.bf16.msra.mxu0 %v385_v4  ;;  %380 = vmatpush3.bf16.msra.mxu1 %v385_v4 }
   0xe   :  { %348 = vmatmul.mubr.msk.bf16.vlgmr.msra.gmra.mxu0 %vm88_vm2, %v386_v5  ;;  %364 = vmatmul.mubr.msk.bf16.vlgmr.msra.gmra.mxu1 %vm88_vm2, %v387_v6 }
   0xf   :  { %351 = vmatprep.mubr.msk.bf16.mxu0 %vm394_vm1, %v393_v0  ;;  %367 = vmatprep.mubr.msk.bf16.mxu1 %vm394_vm1, %v393_v0 }
  0x16   :  { %352 = vmatmul.mubr.msk.bf16.gmra.mxu0 %vm88_vm2, %v388_v7  ;;  %368 = vmatmul.mubr.msk.bf16.gmra.mxu1 %vm88_vm2, %v389_v8 }
  0x17   :  { %355 = vmatprep.mubr.msk.bf16.mxu0 %vm394_vm1, %v393_v0  ;;  %371 = vmatprep.mubr.msk.bf16.mxu1 %vm394_vm1, %v393_v0 }
  0x1e   :  { %356 = vmatmul.mubr.msk.bf16.gmra.mxu0 %vm88_vm2, %v390_v9  ;;  %372 = vmatmul.mubr.msk.bf16.gmra.mxu1 %vm88_vm2, %v391_v10 }
  0x1f   :  { %359 = vmatprep.mubr.msk.bf16.mxu0 %vm394_vm1, %v393_v0 }
  0x26   :  { %360 = vmatmul.mubr.msk.bf16.gmra.mxu0 %vm88_vm2, %v392_v11 }
  0xce   :  { %v148_v13 = vpop.f32.mrf.mxu0  ;;  %v180_v14 = vpop.f32.mrf.mxu1 }
  0xcf   :  { %v149_v15 = vadd.f32 %v462_v12, %v148_v13  ;;  %v181_v16 = vadd.f32 %v462_v12, %v180_v14 }
  0xd0   :  { %v349_v17 = vpop.f32.mrf.mxu0  ;;  %v365_v18 = vpop.f32.mrf.mxu1 }
  0xd1   :  { %v202_v19 = vmax.f32 %v149_v15, 0.0  ;;  %v210_v20 = vmax.f32 %v181_v16, 0.0 }
  0xd2   :  { %v151_v21 = vpop.f32.mrf.mxu0  ;;  %v183_v22 = vpop.f32.mrf.mxu1 }
  0xd3   :  { %v318_v23 = vpack.c.bf16 %v202_v19, %v202_v19  ;;  %v152_v24 = vadd.f32 %v462_v12, %v151_v21  ;;  %v326_v25 = vpack.c.bf16 %v210_v20, %v210_v20  ;;  %v184_v26 = vadd.f32 %v462_v12, %v183_v22 }
  0xd4   :  { %v350_v27 = vpop.f32.mrf.mxu0  ;;  %v366_v28 = vpop.f32.mrf.mxu1 }
  0xd5   :  { %269 = vst.msk [vmem:[%s531_s3] sm:$0xf] %vm268_vm3, %v318_v23  ;;  %v203_v29 = vmax.f32 %v152_v24, 0.0  ;;  %277 = vst.msk [vmem:[%s531_s3 + $0x20] sm:$0xf] %vm268_vm3, %v326_v25  ;;  %v211_v30 = vmax.f32 %v184_v26, 0.0 }
  0xd6   :  { %v156_v31 = vpop.f32.mrf.mxu0  ;;  %v188_v32 = vpop.f32.mrf.mxu1 }
  0xd7   :  { %v319_v33 = vpack.c.bf16 %v203_v29, %v203_v29  ;;  %v157_v34 = vadd.f32 %v462_v12, %v156_v31  ;;  %v327_v35 = vpack.c.bf16 %v211_v30, %v211_v30  ;;  %v189_v36 = vadd.f32 %v462_v12, %v188_v32 }
  0xd8   :  { %v353_v37 = vpop.f32.mrf.mxu0  ;;  %v369_v38 = vpop.f32.mrf.mxu1 }
  0xd9   :  { %270 = vst.msk [vmem:[%s531_s3 + $0x4] sm:$0xf] %vm268_vm3, %v319_v33  ;;  %v204_v39 = vmax.f32 %v157_v34, 0.0  ;;  %278 = vst.msk [vmem:[%s531_s3 + $0x24] sm:$0xf] %vm268_vm3, %v327_v35  ;;  %v212_v40 = vmax.f32 %v189_v36, 0.0 }
  0xda   :  { %v159_v41 = vpop.f32.mrf.mxu0  ;;  %v191_v42 = vpop.f32.mrf.mxu1 }
  0xdb   :  { %v320_v43 = vpack.c.bf16 %v204_v39, %v204_v39  ;;  %v160_v44 = vadd.f32 %v462_v12, %v159_v41  ;;  %v328_v45 = vpack.c.bf16 %v212_v40, %v212_v40  ;;  %v192_v46 = vadd.f32 %v462_v12, %v191_v42 }
  0xdc   :  { %v354_v47 = vpop.f32.mrf.mxu0  ;;  %v370_v48 = vpop.f32.mrf.mxu1 }
  0xdd   :  { %271 = vst.msk [vmem:[%s531_s3 + $0x8] sm:$0xf] %vm268_vm3, %v320_v43  ;;  %v205_v49 = vmax.f32 %v160_v44, 0.0  ;;  %279 = vst.msk [vmem:[%s531_s3 + $0x28] sm:$0xf] %vm268_vm3, %v328_v45  ;;  %v213_v50 = vmax.f32 %v192_v46, 0.0 }
  0xde   :  { %v164_v51 = vpop.f32.mrf.mxu0  ;;  %v196_v52 = vpop.f32.mrf.mxu1 }
  0xdf   :  { %v321_v53 = vpack.c.bf16 %v205_v49, %v205_v49  ;;  %v165_v54 = vadd.f32 %v462_v12, %v164_v51  ;;  %v329_v55 = vpack.c.bf16 %v213_v50, %v213_v50  ;;  %v197_v56 = vadd.f32 %v462_v12, %v196_v52 }
  0xe0   :  { %v357_v57 = vpop.f32.mrf.mxu0  ;;  %v373_v58 = vpop.f32.mrf.mxu1 }
  0xe1   :  { %272 = vst.msk [vmem:[%s531_s3 + $0xc] sm:$0xf] %vm268_vm3, %v321_v53  ;;  %v206_v59 = vmax.f32 %v165_v54, 0.0  ;;  %280 = vst.msk [vmem:[%s531_s3 + $0x2c] sm:$0xf] %vm268_vm3, %v329_v55  ;;  %v214_v60 = vmax.f32 %v197_v56, 0.0 }
  0xe2   :  { %v167_v61 = vpop.f32.mrf.mxu0  ;;  %v199_v62 = vpop.f32.mrf.mxu1 }
  0xe3   :  { %v322_v63 = vpack.c.bf16 %v206_v59, %v206_v59  ;;  %v168_v0 = vadd.f32 %v462_v12, %v167_v61  ;;  %v330_v1 = vpack.c.bf16 %v214_v60, %v214_v60 }
  0xe4   :  { %v358_v2 = vpop.f32.mrf.mxu0  ;;  %v374_v3 = vpop.f32.mrf.mxu1 }
  0xe5   :  { %273 = vst.msk [vmem:[%s531_s3 + $0x10] sm:$0xf] %vm268_vm3, %v322_v63  ;;  %v207_v4 = vmax.f32 %v168_v0, 0.0 }
  0xe6   :  { %282 = vst.msk [vmem:[%s531_s3 + $0x30] sm:$0x1] %vm281_vm4, %v330_v1  ;;  %v172_v5 = vpop.f32.mrf.mxu0 }
  0xe7   :  { %v323_v6 = vpack.c.bf16 %v207_v4, %v207_v4  ;;  %v173_v7 = vadd.f32 %v462_v12, %v172_v5 }
  0xe8   :  { %v361_v8 = vpop.f32.mrf.mxu0 }
  0xe9   :  { %274 = vst.msk [vmem:[%s531_s3 + $0x14] sm:$0xf] %vm268_vm3, %v323_v6  ;;  %v208_v9 = vmax.f32 %v173_v7, 0.0 }
  0xea   :  { %v175_v10 = vpop.f32.mrf.mxu0 }
  0xeb   :  { %v324_v11 = vpack.c.bf16 %v208_v9, %v208_v9  ;;  %v176_v13 = vadd.f32 %v462_v12, %v175_v10 }
  0xec   :  { %v362_v14 = vpop.f32.mrf.mxu0 }
  0xed   :  { %275 = vst.msk [vmem:[%s531_s3 + $0x18] sm:$0xf] %vm268_vm3, %v324_v11  ;;  %v209_v15 = vmax.f32 %v176_v13, 0.0 }
  0xef   :  { %v325_v16 = vpack.c.bf16 %v209_v15, %v209_v15 }
  0xf1   :  { %276 = vst.msk [vmem:[%s531_s3 + $0x1c] sm:$0xf] %vm268_vm3, %v325_v16 }

// kernel: qr_critic_forward.4
= control target key start
LH: loop header
LB: loop body
LE: loop exit
PB: predicated region body
PF: predicated region fallthrough
CT: control target
= control target key end

     0   :  { %vm96_vm0 = vcmask 1043456   ;;  %vm83_vm1 = vcmask 588800   ;;  %vm200_vm2 = vcmask 60416   ;;  %vm207_vm3 = vcmask 57344   ;;  %s370_s1 = inlined_call_operand.vmem [shape: bf16[72,8], index: 1, kind: input, shape index: {}]   ;;  %s371_s0 = inlined_call_operand.vmem [shape: bf16[50,72], index: 0, kind: input, shape index: {}]   ;;  %s372_s2 = inlined_call_operand.vmem [shape: f32[1,8], index: 2, kind: input, shape index: {}]   ;;  %s373_s3 = inlined_call_operand.vmem [shape: bf16[50,8], index: 3, kind: output, shape index: {}]  }
   0x1   :  { %v280_v0 = vld [vmem:[%s370_s1 + $0x20] ss:$0 sps:$4 sm:$0xff]   ;;  %v281_v1 = vld [vmem:[%s370_s1 + $0x18] sm:$0xff]   ;;  %v282_v3 = vld [vmem:[%s370_s1 + $0x10] sm:$0xff]  }
   0x2   :  { %278 = vmatprep.subr.msk.bf16.mxu0 %vm96_vm0, %v280_v0  ;;  %279 = vmatprep.subr.msk.bf16.mxu1 %vm96_vm0, %v280_v0  ;;  %v98_v2 = vsel %vm96_vm0, %v280_v0, 0  ;;  %v285_v4 = vld [vmem:[%s371_s0] sm:$0xff]   ;;  %v286_v5 = vld [vmem:[%s371_s0 + $0x10] sm:$0xff]   ;;  %v283_v6 = vld [vmem:[%s370_s1 + $0x8] sm:$0xff]  }
   0x3   :  { %251 = vmatpush3.bf16.msra.mxu0 %v98_v2  ;;  %273 = vmatpush3.bf16.msra.mxu1 %v98_v2  ;;  %v284_v7 = vld [vmem:[%s370_s1] sm:$0xff]   ;;  %v287_v8 = vld [vmem:[%s371_s0 + $0x8] sm:$0xff]   ;;  %v288_v9 = vld [vmem:[%s371_s0 + $0x18] ss:$0 sps:$4 sm:$0x11]  }
   0x4   :  { %252 = vmatprep.subr.bf16.mxu0 %v281_v1  ;;  %269 = vmatprep.subr.bf16.mxu1 %v281_v1  ;;  %v213_v10 = vld [vmem:[%s372_s2] ss:$0 sm:$0xff] }
   0x5   :  { %260 = vmatprep.mubr.msk.bf16.mxu0 %vm83_vm1, %v285_v4  ;;  %264 = vmatprep.mubr.msk.bf16.mxu1 %vm83_vm1, %v286_v5 }
   0x7   :  { %253 = vmatpush3.bf16.msra.mxu0 %v281_v1  ;;  %274 = vmatpush3.bf16.msra.mxu1 %v281_v1 }
   0x8   :  { %254 = vmatprep.subr.bf16.mxu0 %v282_v3  ;;  %270 = vmatprep.subr.bf16.mxu1 %v282_v3 }
   0xb   :  { %255 = vmatpush3.bf16.msra.mxu0 %v282_v3  ;;  %275 = vmatpush3.bf16.msra.mxu1 %v282_v3 }
   0xc   :  { %256 = vmatprep.subr.bf16.mxu0 %v283_v6  ;;  %271 = vmatprep.subr.bf16.mxu1 %v283_v6 }
   0xf   :  { %257 = vmatpush3.bf16.msra.mxu0 %v283_v6  ;;  %276 = vmatpush3.bf16.msra.mxu1 %v283_v6 }
  0x10   :  { %258 = vmatprep.subr.bf16.mxu0 %v284_v7  ;;  %272 = vmatprep.subr.bf16.mxu1 %v284_v7 }
  0x13   :  { %259 = vmatpush3.bf16.msra.mxu0 %v284_v7  ;;  %277 = vmatpush3.bf16.msra.mxu1 %v284_v7 }
  0x16   :  { %261 = vmatmul.mubr.msk.bf16.vlgmr.msra.gmra.mxu0 %vm83_vm1, %v287_v8  ;;  %265 = vmatmul.mubr.msk.bf16.vlgmr.msra.gmra.mxu1 %vm83_vm1, %v288_v9 }
  0xd6   :  { %v262_v11 = vpop.f32.mrf.mxu0  ;;  %v266_v12 = vpop.f32.mrf.mxu1 }
  0xd7   :  { %v143_v13 = vadd.f32 %v262_v11, %v213_v10  ;;  %v159_v14 = vadd.f32 %v266_v12, %v213_v10 }
  0xd8   :  { %v134_v15 = vpop.f32.mrf.mxu0  ;;  %v150_v16 = vpop.f32.mrf.mxu1 }
  0xd9   :  { %v166_v17 = vmax.f32 %v143_v13, 0.0  ;;  %v170_v18 = vmax.f32 %v159_v14, 0.0  ;;  %v135_v19 = vadd.f32 %v213_v10, %v134_v15  ;;  %v151_v20 = vadd.f32 %v213_v10, %v150_v16 }
  0xda   :  { %v263_v21 = vpop.f32.mrf.mxu0  ;;  %v267_v22 = vpop.f32.mrf.mxu1 }
  0xdb   :  { %v236_v23 = vpack.c.bf16 %v166_v17, %v166_v17  ;;  %v240_v24 = vpack.c.bf16 %v170_v18, %v170_v18  ;;  %v164_v25 = vmax.f32 %v135_v19, 0.0  ;;  %v168_v26 = vmax.f32 %v151_v20, 0.0 }
  0xdc   :  { %v146_v27 = vadd.f32 %v263_v21, %v213_v10  ;;  %v137_v28 = vpop.f32.mrf.mxu0  ;;  %v153_v29 = vpop.f32.mrf.mxu1 }
  0xdd   :  { %203 = vst.msk [vmem:[%s373_s3 + $0x8] sm:$0xf] %vm200_vm2, %v236_v23  ;;  %v234_v30 = vpack.c.bf16 %v164_v25, %v164_v25  ;;  %v238_v31 = vpack.c.bf16 %v168_v26, %v168_v26  ;;  %v138_v32 = vadd.f32 %v213_v10, %v137_v28  ;;  %v154_v33 = vadd.f32 %v213_v10, %v153_v29 }
  0xde   :  { %208 = vst.msk [vmem:[%s373_s3 + $0x18] sm:$0x1] %vm207_vm3, %v240_v24  ;;  %v167_v34 = vmax.f32 %v146_v27, 0.0 }
  0xdf   :  { %201 = vst.msk [vmem:[%s373_s3] sm:$0xf] %vm200_vm2, %v234_v30  ;;  %205 = vst.msk [vmem:[%s373_s3 + $0x10] sm:$0xf] %vm200_vm2, %v238_v31  ;;  %v165_v35 = vmax.f32 %v138_v32, 0.0  ;;  %v169_v36 = vmax.f32 %v154_v33, 0.0 }
  0xe0   :  { %v237_v37 = vpack.c.bf16 %v167_v34, %v167_v34 }
  0xe1   :  { %v235_v38 = vpack.c.bf16 %v165_v35, %v165_v35  ;;  %v239_v39 = vpack.c.bf16 %v169_v36, %v169_v36 }
  0xe2   :  { %204 = vst.msk [vmem:[%s373_s3 + $0xc] sm:$0xf] %vm200_vm2, %v237_v37 }
  0xe3   :  { %202 = vst.msk [vmem:[%s373_s3 + $0x4] sm:$0xf] %vm200_vm2, %v235_v38  ;;  %206 = vst.msk [vmem:[%s373_s3 + $0x14] sm:$0xf] %vm200_vm2, %v239_v39 }

// kernel: qr_critic_forward.5
= control target key start
LH: loop header
LB: loop body
LE: loop exit
PB: predicated region body
PF: predicated region fallthrough
CT: control target
= control target key end

     0   :  { %v764_v0 = vmov 0   ;;  %v765_v3 = vmov 1966171168   ;;  %v90_v5 = vlaneseq  ;;  %vm177_vm0 = vcmask 588800   ;;  %s996_s2 = inlined_call_operand.vmem [shape: bf16[200,32], index: 2, kind: input, shape index: {}]   ;;  %s997_s0 = inlined_call_operand.vmem [shape: bf16[2,200], index: 0, kind: input, shape index: {}]   ;;  %s998_s3 = inlined_call_operand.vmem [shape: f32[1,32], index: 3, kind: input, shape index: {}]   ;;  %s999_s7 = inlined_call_operand.vmem [shape: bf16[8,128], index: 7, kind: input, shape index: {}]   ;;  %s1000_s6 = inlined_call_operand.vmem [shape: bf16[32,128], index: 6, kind: input, shape index: {}]   ;;  %s1001_s1 = inlined_call_operand.vmem [shape: f32[2,8], index: 1, kind: input, shape index: {}]   ;;  %s1002_s9 = inlined_call_operand.vmem [shape: bf16[128,128], index: 9, kind: input, shape index: {}]   ;;  %s1003_s4 = inlined_call_operand.vmem [shape: f32[1,32], index: 4, kind: input, shape index: {}]   ;;  %s1004_s5 = inlined_call_operand.vmem [shape: f32[1,32], index: 5, kind: input, shape index: {}]   ;;  %s1005_s11 = inlined_call_operand.vmem [shape: bf16[128,128], index: 11, kind: input, shape index: {}]   ;;  %s1006_s8 = inlined_call_operand.vmem [shape: f32[1,128], index: 8, kind: input, shape index: {}]   ;;  %s1007_s10 = inlined_call_operand.vmem [shape: f32[1,128], index: 10, kind: input, shape index: {}]   ;;  %s1008_s12 = inlined_call_operand.vmem [shape: f32[1,128], index: 12, kind: input, shape index: {}]   ;;  %s1009_s13 = inlined_call_operand.vmem [shape: f32[2,128], index: 13, kind: output, shape index: {}]  }
   0x1   :  { %185 = vmatprep.subr.bf16.mxu0 %v764_v0  ;;  %v731_v1 = vld [vmem:[%s996_s2 + $0x38] sm:$0xff]   ;;  %v732_v2 = vld [vmem:[%s996_s2 + $0x30] sm:$0xff]   ;;  %v88_v4 = vunpack.c.l.s4 %v765_v3  ;;  %v733_v6 = vld [vmem:[%s996_s2 + $0x28] sm:$0xff]   ;;  %vm181_vm1 = vcmask 1043456   ;;  %vm225_vm2 = vcmask 254976   ;;  %v766_v34 = vmov 0.0  }
   0x2   :  { %186 = vmatpush1.bf16.msra.mxu0 %v731_v1  ;;  %v91_v8 = vshrl.u32 %v90_v5, 7  ;;  %v734_v9 = vld [vmem:[%s996_s2 + $0x20] sm:$0xff]   ;;  %v735_v12 = vld [vmem:[%s996_s2 + $0x18] sm:$0xff]   ;;  %v736_v15 = vld [vmem:[%s996_s2 + $0x10] sm:$0xff]   ;;  %673 = vmatprep.subr.bf16.mxu1 %v766_v34  ;;  %vm767_vm3 = vmmov 0   ;;  %vm267_vm4 = vcmask 64512  }
   0x3   :  { %187 = vmatprep.subr.bf16.mxu0 %v764_v0  ;;  %v89_v7 = vunpack.c.0.s8 %v88_v4  ;;  %v610_v11 = vld.sshfl [vmem:[%s997_s0] sm:$0x11 pattern:$0x75316420]  ;;  %v737_v16 = vld [vmem:[%s996_s2 + $0x8] sm:$0xff]   ;;  %v740_v20 = vld [vmem:[%s996_s2 + $0x58] sm:$0xff]   ;;  %675 = vmatprep.mubr.msk.bf16.mxu1 %vm767_vm3, %v766_v34 }
   0x4   :  { %v86_v13 = vcombine.high %v610_v11, %v610_v11  ;;  %v738_v17 = vld [vmem:[%s996_s2] sm:$0xff]   ;;  %v741_v21 = vld [vmem:[%s996_s2 + $0x50] sm:$0xff]   ;;  %v742_v22 = vld [vmem:[%s996_s2 + $0x48] sm:$0xff]   ;;  %vm326_vm5 = vcmask 261120  }
   0x5   :  { %v92_v10 = vsub.s32 %v89_v7, %v91_v8  ;;  %v739_v18 = vld [vmem:[%s996_s2 + $0x60] ss:$0 sps:$4 sm:$0xff]   ;;  %v744_v37 = vld [vmem:[%s1000_s6 + $0x8] sm:$0xff]   ;;  %v746_v41 = vld [vmem:[%s1002_s9 + $0x38] sm:$0xff]  }
   0x6   :  { %188 = vmatpush1.bf16.msra.mxu0 %v732_v2  ;;  %v183_v19 = vsel %vm181_vm1, %v739_v18, 0  ;;  %v743_v23 = vld [vmem:[%s996_s2 + $0x40] sm:$0xff]   ;;  %v747_v42 = vld [vmem:[%s1002_s9 + $0x30] sm:$0xff]   ;;  %v748_v43 = vld [vmem:[%s1002_s9 + $0x28] sm:$0xff]  }
   0x7   :  { %189 = vmatprep.subr.bf16.mxu0 %v764_v0  ;;  %v100_v14 = vrot.slane %v86_v13, %v92_v10  ;;  %v93_v24 = vrot.slane %v610_v11, %v92_v10  ;;  %v609_v25 = vld [vmem:[%s998_s3] ss:$0 sm:$0xff]  ;;  %v750_v45 = vld [vmem:[%s1002_s9 + $0x18] sm:$0xff]   ;;  %v751_v46 = vld [vmem:[%s1002_s9 + $0x10] sm:$0xff]  }
   0x8   :  { %v266_v35 = vld [vmem:[%s999_s7] sm:$0xf]  ;;  %v752_v3 = vld [vmem:[%s1002_s9 + $0x8] sm:$0xff]   ;;  %v754_v13 = vld [vmem:[%s1005_s11 + $0x38] sm:$0xff]  }
   0x9   :  { %624 = vmatprep.mubr.msk.bf16.mxu0 %vm177_vm0, %v100_v14  ;;  %v272_v36 = vsel %vm181_vm1, %v266_v35, 0  ;;  %v260_v38 = vld [vmem:[%s1001_s1] sm:$0x3]  ;;  %v758_v18 = vld [vmem:[%s1005_s11 + $0x18] sm:$0xff]  }
   0xa   :  { %190 = vmatpush1.bf16.msra.mxu0 %v733_v6  ;;  %674 = vmatpush3.bf16.msra.mxu1 %v272_v36  ;;  %v261_v39 = vpack.c.bf16 %v260_v38, %v260_v38  ;;  %v745_v40 = vld [vmem:[%s1000_s6] sm:$0xff]  }
   0xb   :  { %191 = vmatprep.subr.bf16.mxu0 %v764_v0  ;;  %687 = vmatprep.subr.bf16.mxu1 %v766_v34  ;;  %v749_v44 = vld [vmem:[%s1002_s9 + $0x20] sm:$0xff]  }
   0xc   :  { %v625_v57 = vld [vmem:[%s1003_s4] ss:$0 sm:$0xff] }
   0xd   :  { %676 = vmatmul.mubr.msk.bf16.vlgmr.msra.gmra.mxu1 %vm267_vm4, %v261_v39  ;;  %v626_v59 = vld [vmem:[%s1004_s5] ss:$0 sm:$0xff] }
   0xe   :  { %192 = vmatpush1.bf16.msra.mxu0 %v734_v9  ;;  %703 = vmatprep.mubr.msk.bf16.mxu1 %vm767_vm3, %v766_v34  ;;  %v753_v4 = vld [vmem:[%s1002_s9] sm:$0xff]  }
   0xf   :  { %193 = vmatprep.subr.bf16.mxu0 %v764_v0  ;;  %688 = vmatpush3.bf16.msra.mxu1 %v746_v41  ;;  %v631_v6 = vld [vmem:[%s1006_s8] ss:$0 sm:$0xff] }
  0x10   :  { %689 = vmatprep.subr.bf16.mxu1 %v766_v34 }
  0x12   :  { %194 = vmatpush1.bf16.msra.mxu0 %v735_v12 }
  0x13   :  { %195 = vmatprep.subr.bf16.mxu0 %v764_v0  ;;  %690 = vmatpush3.bf16.msra.mxu1 %v747_v42 }
  0x14   :  { %691 = vmatprep.subr.bf16.mxu1 %v766_v34 }
  0x16   :  { %196 = vmatpush1.bf16.msra.mxu0 %v736_v15  ;;  %v755_v15 = vld [vmem:[%s1005_s11 + $0x30] sm:$0xff]  }
  0x17   :  { %197 = vmatprep.subr.bf16.mxu0 %v764_v0  ;;  %692 = vmatpush3.bf16.msra.mxu1 %v748_v43 }
  0x18   :  { %693 = vmatprep.subr.bf16.mxu1 %v766_v34 }
  0x1a   :  { %198 = vmatpush1.bf16.msra.mxu0 %v737_v16  ;;  %v756_v16 = vld [vmem:[%s1005_s11 + $0x28] sm:$0xff]  }
  0x1b   :  { %199 = vmatprep.subr.bf16.mxu0 %v764_v0  ;;  %694 = vmatpush3.bf16.msra.mxu1 %v749_v44 }
  0x1c   :  { %695 = vmatprep.subr.bf16.mxu1 %v766_v34 }
  0x1e   :  { %200 = vmatpush1.bf16.msra.mxu0 %v738_v17  ;;  %v757_v17 = vld [vmem:[%s1005_s11 + $0x20] sm:$0xff]  }
  0x1f   :  { %207 = vmatprep.subr.bf16.mxu0 %v764_v0  ;;  %696 = vmatpush3.bf16.msra.mxu1 %v750_v45 }
  0x20   :  { %697 = vmatprep.subr.bf16.mxu1 %v766_v34 }
  0x22   :  { %208 = vmatpush2.bf16.msra.mxu0 %v183_v19  ;;  %v759_v19 = vld [vmem:[%s1005_s11 + $0x10] sm:$0xff]  }
  0x23   :  { %209 = vmatprep.subr.bf16.mxu0 %v764_v0  ;;  %698 = vmatpush3.bf16.msra.mxu1 %v751_v46 }
  0x24   :  { %699 = vmatprep.subr.bf16.mxu1 %v766_v34 }
  0x26   :  { %210 = vmatpush2.bf16.msra.mxu0 %v740_v20  ;;  %v760_v20 = vld [vmem:[%s1005_s11 + $0x8] sm:$0xff]  }
  0x27   :  { %211 = vmatprep.subr.bf16.mxu0 %v764_v0  ;;  %700 = vmatpush3.bf16.msra.mxu1 %v752_v3 }
  0x28   :  { %701 = vmatprep.subr.bf16.mxu1 %v766_v34 }
  0x2a   :  { %212 = vmatpush2.bf16.msra.mxu0 %v741_v21  ;;  %v761_v21 = vld [vmem:[%s1005_s11] sm:$0xff]  }
  0x2b   :  { %213 = vmatprep.subr.bf16.mxu0 %v764_v0  ;;  %702 = vmatpush3.bf16.msra.mxu1 %v753_v4 }
  0x2c   :  { %707 = vmatprep.subr.bf16.mxu1 %v766_v34 }
  0x2e   :  { %214 = vmatpush2.bf16.msra.mxu0 %v742_v22  ;;  %v632_v22 = vld [vmem:[%s1007_s10] ss:$0 sm:$0xff] }
  0x2f   :  { %215 = vmatprep.subr.bf16.mxu0 %v764_v0 }
  0x32   :  { %216 = vmatpush2.bf16.msra.mxu0 %v743_v23 }
  0x33   :  { %679 = vmatprep.subr.bf16.mxu0 %v766_v34 }
  0x35   :  { %218 = vmatmul.mubr.bf16.vlgmr.msra.gmra.mxu0 %v93_v24 }
  0x36   :  { %683 = vmatprep.mubr.msk.bf16.mxu0 %vm767_vm3, %v766_v34  ;;  %680 = vmatpush3.bf16.msra.mxu0 %v744_v37 }
  0x37   :  { %681 = vmatprep.subr.bf16.mxu0 %v766_v34 }
  0x3a   :  { %682 = vmatpush3.bf16.msra.mxu0 %v745_v40 }
  0xcd   :  { %v308_v63 = vpop.f32.mrf.mxu1 }
  0xcf   :  { %v677_v0 = vpop.f32.mrf.mxu1 }
  0xd1   :  { %v311_v1 = vpop.f32.mrf.mxu1 }
  0xd3   :  { %v678_v2 = vpop.f32.mrf.mxu1 }
  0xf5   :  { %v219_v26 = vpop.f32.mrf.mxu0 }
  0xf6   :  { %v884_v27 = vadd.f32 %v609_v25, %v219_v26 }
  0xf7   :  { %v221_v28 = vpop.f32.mrf.mxu0 }
  0xf8   :  { %v226_v29 = vsel %vm225_vm2, %v884_v27, 0.0  ;;  %v231_v30 = vmul.f32 %v884_v27, %v884_v27 }
  0xf9   :  { %v222_v31 = vpop.f32.mrf.mxu0  ;;  %227 = vadd.xlane.f32.xlu0 %v226_v29 }
  0xfa   :  { %v232_v33 = vsel %vm225_vm2, %v231_v30, 0.0  ;;  %v641_v30 = vld [vmem:[%s1008_s12] ss:$0 sm:$0xff] }
  0xfb   :  { %v223_v32 = vpop.f32.mrf.mxu0 }
  0xfd   :  { %233 = vadd.xlane.f32.xlu0 %v232_v33 }
 0x182   :  { %v228_v47 = vpop.xlane.xlu0 %227 }
 0x183   :  { %v230_v48 = vmul.f32 0.03125, %v228_v47 }
 0x185   :  { %v236_v50 = vmul.f32 %v230_v48, %v230_v48  ;;  %v239_v55 = vsub.f32 %v884_v27, %v230_v48 }
 0x186   :  { %v234_v49 = vpop.xlane.xlu0 %233 }
 0x187   :  { %v235_v51 = vmul.f32 0.03125, %v234_v49 }
 0x189   :  { %v237_v52 = vsub.f32 %v235_v51, %v236_v50 }
 0x18b   :  { %v238_v53 = vmax.f32 %v237_v52, 0.0 }
 0x18d   :  { %v240_v54 = vadd.f32 1e-05, %v238_v53 }
 0x18f   :  { %762 = vrsqrt.f32 %v240_v54 }
 0x19c   :  { %v763_v56 = vpop.eup %762 }
 0x19d   :  { %v242_v58 = vmul.f32 %v763_v56, %v239_v55 }
 0x19f   :  { %v250_v60 = vmul.f32 %v625_v57, %v242_v58 }
 0x1a1   :  { %v258_v61 = vadd.f32 %v626_v59, %v250_v60 }
 0x1a3   :  { %v259_v62 = vpack.c.bf16 %v258_v61, %v258_v61 }
 0x1a5   :  { %684 = vmatmul.mubr.msk.bf16.vlgmr.msra.gmra.mxu0 %vm326_vm5, %v259_v62 }
 0x265   :  { %v364_v5 = vpop.f32.mrf.mxu0 }
 0x266   :  { %v365_v7 = vadd.f32 %v364_v5, %v308_v63 }
 0x267   :  { %v685_v8 = vpop.f32.mrf.mxu0 }
 0x268   :  { %v377_v9 = vadd.f32 %v631_v6, %v365_v7 }
 0x269   :  { %v367_v10 = vpop.f32.mrf.mxu0 }
 0x26a   :  { %v378_v11 = vmax.f32 %v377_v9, 0.0 }
 0x26b   :  { %v686_v12 = vpop.f32.mrf.mxu0 }
 0x26c   :  { %v379_v14 = vpack.c.bf16 %v378_v11, %v378_v11 }
 0x26e   :  { %704 = vmatmul.mubr.bf16.vlgmr.msra.gmra.mxu1 %v379_v14 }
 0x26f   :  { %708 = vmatpush3.bf16.msra.mxu1 %v754_v13  ;;  %723 = vmatprep.mubr.msk.bf16.mxu1 %vm767_vm3, %v766_v34 }
 0x270   :  { %709 = vmatprep.subr.bf16.mxu1 %v766_v34 }
 0x273   :  { %710 = vmatpush3.bf16.msra.mxu1 %v755_v15 }
 0x274   :  { %711 = vmatprep.subr.bf16.mxu1 %v766_v34 }
 0x277   :  { %712 = vmatpush3.bf16.msra.mxu1 %v756_v16 }
 0x278   :  { %713 = vmatprep.subr.bf16.mxu1 %v766_v34 }
 0x27b   :  { %714 = vmatpush3.bf16.msra.mxu1 %v757_v17 }
 0x27c   :  { %715 = vmatprep.subr.bf16.mxu1 %v766_v34 }
 0x27f   :  { %716 = vmatpush3.bf16.msra.mxu1 %v758_v18 }
 0x280   :  { %717 = vmatprep.subr.bf16.mxu1 %v766_v34 }
 0x283   :  { %718 = vmatpush3.bf16.msra.mxu1 %v759_v19 }
 0x284   :  { %719 = vmatprep.subr.bf16.mxu1 %v766_v34 }
 0x287   :  { %720 = vmatpush3.bf16.msra.mxu1 %v760_v20 }
 0x288   :  { %721 = vmatprep.subr.bf16.mxu1 %v766_v34 }
 0x28b   :  { %722 = vmatpush3.bf16.msra.mxu1 %v761_v21 }
 0x32e   :  { %v485_v23 = vpop.f32.mrf.mxu1 }
 0x32f   :  { %v486_v24 = vadd.f32 %v632_v22, %v485_v23 }
 0x330   :  { %v705_v25 = vpop.f32.mrf.mxu1 }
 0x331   :  { %v491_v26 = vmax.f32 %v486_v24, 0.0 }
 0x332   :  { %v488_v27 = vpop.f32.mrf.mxu1 }
 0x333   :  { %v492_v28 = vpack.c.bf16 %v491_v26, %v491_v26 }
 0x334   :  { %v706_v29 = vpop.f32.mrf.mxu1 }
 0x335   :  { %724 = vmatmul.mubr.bf16.vlgmr.msra.gmra.mxu1 %v492_v28 }
 0x3f5   :  { %v598_v31 = vpop.f32.mrf.mxu1 }
 0x3f6   :  { %v599_v32 = vadd.f32 %v641_v30, %v598_v31 }
 0x3f7   :  { %v725_v33 = vpop.f32.mrf.mxu1 }
 0x3f8   :  { %604 = vst [vmem:[%s1009_s13] sm:$0x3] %v599_v32 }
 0x3f9   :  { %v601_v34 = vpop.f32.mrf.mxu1 }
 0x3fb   :  { %v726_v35 = vpop.f32.mrf.mxu1 }

</bundles_post_ra>
